<compile_context>
chip_gen: v7x
topology: tpu7x:2x2x1
jax: 0.10.0
libtpu: 0.0.40
codegen_flags: <defaults>
</compile_context>

<pallas_src>
import functools
import math

import jax
import jax.numpy as jnp
from jax.experimental import pallas as pl
from jax.experimental.pallas import tpu as pltpu


def _ln(x, g, b, eps):
    mu = jnp.mean(x, axis=-1, keepdims=True)
    var = jnp.mean(jnp.square(x - mu), axis=-1, keepdims=True)
    return (x - mu) * jax.lax.rsqrt(var + eps) * g + b


def fused_layer_kernel(x_ref, bonds0_ref, hmap_ref, hmapt_ref,
                       wq_ref, bq_ref, wkv_ref, bkv_ref, wout_ref, bout_ref, ee_ref,
                       w1_ref, b1_ref, w2_ref, b2_ref,
                       g1_ref, bt1_ref, g2_ref, bt2_ref,
                       o_ref, *, eps):
    f32, bf16 = jnp.float32, jnp.bfloat16
    L, E = x_ref.shape[1], x_ref.shape[2]
    V = ee_ref.shape[1]
    layer = pl.program_id(1)

    # Layer 0: bring this batch element's activation into the resident output block.
    @pl.when(layer == 0)
    def _():
        o_ref[0] = x_ref[0]

    x = o_ref[0]                      # [L, E] f32, resident in VMEM across the layer axis

    hmap = hmap_ref[...]              # [E, H] 0/1 head selector (embed lane -> head)
    hmap_t = hmapt_ref[...]           # [H, E]

    # ---------------- self-attention block on norm1(x) ----------------
    xn = _ln(x, g1_ref[0], bt1_ref[0], eps)                                  # [L, E] f32
    xn_bf = xn.astype(bf16)

    # k/v: one [L,E] x [E,2E] bf16 matmul with f32 accumulation.
    kv = jnp.dot(xn_bf, wkv_ref[0], preferred_element_type=f32) + bkv_ref[0]  # [L, 2E]
    k = kv[:, :E]
    v = kv[:, E:]
    # q only for query position 0 (the `[0]` residual makes all other rows dead);
    # 1/sqrt(head_dim) is folded into wq/bq at pack time.
    q0 = jnp.dot(xn_bf[0:1, :], wq_ref[0], preferred_element_type=f32) + bq_ref[0]  # [1, E]

    # Additive per-head edge bias for query row 0: one-hot(bonds[b,0,:]) @ edge table.
    one_hot = (bonds0_ref[0] ==
               jax.lax.broadcasted_iota(jnp.int32, (L, V), 1)).astype(f32)    # [L, V]
    ebias = jnp.dot(one_hot, ee_ref[0], preferred_element_type=f32)           # [L, H]

    # Scores s[m, h] = <q0, k[m]> restricted to head h, plus edge bias.
    s = jnp.dot(k * q0, hmap, preferred_element_type=f32) + ebias             # [L, H]
    s = s - jnp.max(s, axis=0, keepdims=True)
    p = jnp.exp(s)
    p = p * pl.reciprocal(jnp.sum(p, axis=0, keepdims=True), approx=True)     # [L, H]

    # PV for query 0: expand per-head weights back to E lanes, weight v, reduce over keys.
    p_exp = jnp.dot(p, hmap_t, preferred_element_type=f32)                    # [L, E]
    o_head = jnp.sum(p_exp * v, axis=0, keepdims=True)                        # [1, E]

    # Head-concat already folded into the flat [1, E] layout; single out-projection.
    attn0 = jnp.dot(o_head.astype(bf16), wout_ref[0],
                    preferred_element_type=f32) + bout_ref[0]                 # [1, E]
    # GraphAttention.forward returns a tensor, so `self_attn(...)[0]` selects
    # sequence position 0 and is broadcast-added over all L rows (faithful).
    x = x + attn0

    # ---------------- feed-forward block on norm2(x) ----------------
    xn2 = _ln(x, g2_ref[0], bt2_ref[0], eps)
    hid = jnp.maximum(
        jnp.dot(xn2.astype(bf16), w1_ref[0], preferred_element_type=f32) + b1_ref[0],
        0.0)
    ff = jnp.dot(hid.astype(bf16), w2_ref[0], preferred_element_type=f32) + b2_ref[0]
    x = x + ff

    o_ref[0] = x.astype(o_ref.dtype)


def graph_encoder(nodes, node_padding_mask, bonds, packed, *, n_layers, num_heads, edge_voc):
    """nodes: [B, L, E] f32, bonds: [B, L, L] int -> output [L, B, E] (matches module)."""
    # With src_mask=None the reference module never folds node_padding_mask into the
    # attention weights, so it is (faithfully) unused here as well.
    del node_padding_mask, edge_voc
    B, L, E = nodes.shape
    hd = E // num_heads

    # Only bond row 0 matters (row-0-only residual) -> no [B,L,L] DMA at all.
    bonds0 = bonds[:, 0, :].astype(jnp.int32)[:, :, None]                    # [B, L, 1]

    # Layer-invariant 0/1 head-selector matrices (plain-JAX glue, built once).
    head_ids = jnp.arange(E, dtype=jnp.int32) // hd
    head_map = (head_ids[:, None] ==
                jnp.arange(num_heads, dtype=jnp.int32)[None, :]).astype(jnp.float32)  # [E, H]
    head_map_t = head_map.T                                                            # [H, E]

    weight_keys = ('wq', 'bq', 'wkv', 'bkv', 'wout', 'bout', 'ee',
                   'w1', 'b1', 'w2', 'b2', 'g1', 'bt1', 'g2', 'bt2')
    weights = tuple(packed[k] for k in weight_keys)

    def _layer_spec(a):
        nrest = a.ndim - 1
        return pl.BlockSpec((1,) + a.shape[1:],
                            lambda b, l, _n=nrest: (l,) + (0,) * _n)

    kernel = functools.partial(fused_layer_kernel, eps=1e-5)

    out = pl.pallas_call(
        kernel,
        out_shape=jax.ShapeDtypeStruct((B, L, E), jnp.float32),
        grid=(B, n_layers),
        in_specs=[pl.BlockSpec((1, L, E), lambda b, l: (b, 0, 0)),
                  pl.BlockSpec((1, L, 1), lambda b, l: (b, 0, 0)),
                  pl.BlockSpec((E, num_heads), lambda b, l: (0, 0)),
                  pl.BlockSpec((num_heads, E), lambda b, l: (0, 0))]
                 + [_layer_spec(w) for w in weights],
        out_specs=pl.BlockSpec((1, L, E), lambda b, l: (b, 0, 0)),
        compiler_params=pltpu.CompilerParams(
            dimension_semantics=("parallel", "arbitrary"),
            vmem_limit_bytes=32 * 1024 * 1024),
    )(nodes, bonds0, head_map, head_map_t, *weights)
    # GraphEncoder(norm=None) -> no final LayerNorm; module returns [L, B, E].
    return jnp.transpose(out, (1, 0, 2))


# -------------------- parameter creation / packing (plain-JAX glue) --------------------

def init_layer_params(key, E, H, dff, V, pad_tok):
    """Raw PyTorch-layout parameters for one GraphAttentionLayer."""
    ks = jax.random.split(key, 9)
    s = 0.05

    def n(k, shape):
        return jax.random.normal(k, shape, jnp.float32) * s

    return dict(
        w_in=n(ks[0], (3 * E, E)), b_in=n(ks[1], (3 * E,)),
        w_out=n(ks[2], (E, E)), b_out=n(ks[3], (E,)),
        edge_emb=n(ks[4], (V, H)).at[pad_tok].set(0.0),        # padding_idx row zeroed
        w1=n(ks[5], (dff, E)), b1=n(ks[6], (dff,)),
        w2=n(ks[7], (E, dff)), b2=n(ks[8], (E,)),
        g1=jnp.ones((E,), jnp.float32), bt1=jnp.zeros((E,), jnp.float32),
        g2=jnp.ones((E,), jnp.float32), bt2=jnp.zeros((E,), jnp.float32),
    )


def pack_params(layer_params, E, H):
    """Stack per-layer weights along a leading layer axis in kernel-friendly layout."""
    hd = E // H
    scale = 1.0 / math.sqrt(hd)
    bf16 = jnp.bfloat16
    keys = ('wq', 'bq', 'wkv', 'bkv', 'wout', 'bout', 'ee',
            'w1', 'b1', 'w2', 'b2', 'g1', 'bt1', 'g2', 'bt2')
    acc = {k: [] for k in keys}
    for p in layer_params:
        w_in, b_in = p['w_in'], p['b_in']                      # [3E, E], [3E]
        acc['wq'].append((w_in[:E].T * scale).astype(bf16))    # [E, E], 1/sqrt(hd) folded
        acc['bq'].append((b_in[:E] * scale).reshape(1, E))
        acc['wkv'].append(jnp.concatenate([w_in[E:2 * E].T, w_in[2 * E:].T],
                                          axis=1).astype(bf16))            # [E, 2E]
        acc['bkv'].append(jnp.concatenate([b_in[E:2 * E], b_in[2 * E:]]).reshape(1, 2 * E))
        acc['wout'].append(p['w_out'].T.astype(bf16))          # [E, E] (concat folded)
        acc['bout'].append(p['b_out'].reshape(1, E))
        acc['ee'].append(p['edge_emb'])                        # [V, H] f32
        acc['w1'].append(p['w1'].T.astype(bf16))               # [E, dff]
        acc['b1'].append(p['b1'].reshape(1, -1))
        acc['w2'].append(p['w2'].T.astype(bf16))               # [dff, E]
        acc['b2'].append(p['b2'].reshape(1, E))
        acc['g1'].append(p['g1'].reshape(1, E)); acc['bt1'].append(p['bt1'].reshape(1, E))
        acc['g2'].append(p['g2'].reshape(1, E)); acc['bt2'].append(p['bt2'].reshape(1, E))
    return {k: jnp.stack(v) for k, v in acc.items()}


# -------------------- pure-JAX f32 reference (same math) --------------------

def _ref_layer(x_bf, bonds, p, H, eps=1e-5):
    def ln(x, g, b):
        mu = x.mean(-1, keepdims=True)
        var = ((x - mu) ** 2).mean(-1, keepdims=True)
        return (x - mu) / jnp.sqrt(var + eps) * g + b

    B, L, E = x_bf.shape
    hd = E // H
    eb = jnp.transpose(p['edge_emb'][bonds], (0, 3, 1, 2))      # [B, H, L, L]
    outs = []
    for b in range(B):
        x = x_bf[b]
        xn = ln(x, p['g1'], p['bt1'])
        qkv = xn @ p['w_in'].T + p['b_in']
        heads = []
        for h in range(H):
            lo = h * hd
            qh = qkv[:, lo:lo + hd] / math.sqrt(hd)
            kh = qkv[:, E + lo:E + lo + hd]
            vh = qkv[:, 2 * E + lo:2 * E + lo + hd]
            s = qh @ kh.T + eb[b, h]
            heads.append(jax.nn.softmax(s, axis=-1) @ vh)
        attn = jnp.concatenate(heads, -1) @ p['w_out'].T + p['b_out']
        x1 = x + attn[0:1, :]                                    # faithful `[0]` residual
        xn2 = ln(x1, p['g2'], p['bt2'])
        ff = jnp.maximum(xn2 @ p['w1'].T + p['b1'], 0.0) @ p['w2'].T + p['b2']
        outs.append(x1 + ff)
    return jnp.stack(outs, 0)


if __name__ == "__main__":
    B, L, E, H, dff = 2, 8, 32, 4, 64
    V, pad_tok, n_layer = 8, 0, 2

    key = jax.random.PRNGKey(0)
    k_nodes, k_bonds, _k_mask, *k_layers = jax.random.split(key, 3 + n_layer)
    nodes = jax.random.normal(k_nodes, (B, L, E), jnp.float32)
    bonds = jax.random.randint(k_bonds, (B, L, L), 0, V)
    node_padding_mask = jnp.zeros((B, L), jnp.float32)
    layer_params = [init_layer_params(k, E, H, dff, V, pad_tok) for k in k_layers]
    packed = pack_params(layer_params, E, H)

    out = graph_encoder(nodes, node_padding_mask, bonds, packed,
                        n_layers=n_layer, num_heads=H, edge_voc=V)
    out = jax.block_until_ready(out)
    assert out.shape == (L, B, E), out.shape
    assert bool(jnp.all(jnp.isfinite(out)))

    # cross-check against a pure-JAX f32 reference of the same math
    x_ref = nodes
    for p in layer_params:
        x_ref = _ref_layer(x_ref, bonds, p, H)
    ref = jnp.transpose(x_ref, (1, 0, 2))
    max_err = float(jnp.max(jnp.abs(out - ref)))
    assert jnp.allclose(out, ref, atol=2e-2, rtol=2e-2), max_err

    print("KERNEL_OK")
</pallas_src>

<mosaic_0001>
module attributes {stable_mosaic.version = 11 : i64} {
  func.func @fused_layer_kernel(%arg0: i32, %arg1: i32, %arg2: memref<1x8x32xf32, #tpu.memory_space<vmem>>, %arg3: memref<1x8x1xi32, #tpu.memory_space<vmem>>, %arg4: memref<32x4xf32, #tpu.memory_space<vmem>>, %arg5: memref<4x32xf32, #tpu.memory_space<vmem>>, %arg6: memref<1x32x32xbf16, #tpu.memory_space<vmem>>, %arg7: memref<1x1x32xf32, #tpu.memory_space<vmem>>, %arg8: memref<1x32x64xbf16, #tpu.memory_space<vmem>>, %arg9: memref<1x1x64xf32, #tpu.memory_space<vmem>>, %arg10: memref<1x32x32xbf16, #tpu.memory_space<vmem>>, %arg11: memref<1x1x32xf32, #tpu.memory_space<vmem>>, %arg12: memref<1x8x4xf32, #tpu.memory_space<vmem>>, %arg13: memref<1x32x64xbf16, #tpu.memory_space<vmem>>, %arg14: memref<1x1x64xf32, #tpu.memory_space<vmem>>, %arg15: memref<1x64x32xbf16, #tpu.memory_space<vmem>>, %arg16: memref<1x1x32xf32, #tpu.memory_space<vmem>>, %arg17: memref<1x1x32xf32, #tpu.memory_space<vmem>>, %arg18: memref<1x1x32xf32, #tpu.memory_space<vmem>>, %arg19: memref<1x1x32xf32, #tpu.memory_space<vmem>>, %arg20: memref<1x1x32xf32, #tpu.memory_space<vmem>>, %arg21: memref<1x8x32xf32, #tpu.memory_space<vmem>>) attributes {dimension_semantics = [#tpu.dimension_semantics<parallel>, #tpu.dimension_semantics<arbitrary>], iteration_bounds = array<i64: 2, 2>, scalar_prefetch = 0 : i64, scratch_operands = 0 : i64, tpu.core_type = #tpu.core_type<tc>, window_params = [{transform_indices = @transform_0, window_bounds = array<i64: 1, 8, 32>}, {transform_indices = @transform_1, window_bounds = array<i64: 1, 8, 1>}, {pipeline_mode = #tpu.pipeline_mode<synchronous>, transform_indices = @transform_2, window_bounds = array<i64: 32, 4>}, {pipeline_mode = #tpu.pipeline_mode<synchronous>, transform_indices = @transform_3, window_bounds = array<i64: 4, 32>}, {transform_indices = @transform_4, window_bounds = array<i64: 1, 32, 32>}, {transform_indices = @transform_5, window_bounds = array<i64: 1, 1, 32>}, {transform_indices = @transform_6, window_bounds = array<i64: 1, 32, 64>}, {transform_indices = @transform_7, window_bounds = array<i64: 1, 1, 64>}, {transform_indices = @transform_8, window_bounds = array<i64: 1, 32, 32>}, {transform_indices = @transform_9, window_bounds = array<i64: 1, 1, 32>}, {transform_indices = @transform_10, window_bounds = array<i64: 1, 8, 4>}, {transform_indices = @transform_11, window_bounds = array<i64: 1, 32, 64>}, {transform_indices = @transform_12, window_bounds = array<i64: 1, 1, 64>}, {transform_indices = @transform_13, window_bounds = array<i64: 1, 64, 32>}, {transform_indices = @transform_14, window_bounds = array<i64: 1, 1, 32>}, {transform_indices = @transform_15, window_bounds = array<i64: 1, 1, 32>}, {transform_indices = @transform_16, window_bounds = array<i64: 1, 1, 32>}, {transform_indices = @transform_17, window_bounds = array<i64: 1, 1, 32>}, {transform_indices = @transform_18, window_bounds = array<i64: 1, 1, 32>}, {transform_indices = @transform_19, window_bounds = array<i64: 1, 8, 32>}]} {
    %c0_i32 = arith.constant 0 : i32
    %0 = arith.cmpi eq, %arg1, %c0_i32 : i32
    %1 = arith.extui %0 : i1 to i32
    %c0_i32_0 = arith.constant 0 : i32
    %2 = arith.cmpi ne, %1, %c0_i32_0 : i32
    scf.if %2 {
      %c0_79 = arith.constant 0 : index
      %c0_80 = arith.constant 0 : index
      %c0_81 = arith.constant 0 : index
      %135 = vector.load %arg2[%c0_79, %c0_80, %c0_81] : memref<1x8x32xf32, #tpu.memory_space<vmem>>, vector<1x8x32xf32>
      %136 = vector.shape_cast %135 : vector<1x8x32xf32> to vector<8x32xf32>
      %c0_82 = arith.constant 0 : index
      %c0_83 = arith.constant 0 : index
      %c0_84 = arith.constant 0 : index
      %137 = vector.load %arg21[%c0_82, %c0_83, %c0_84] : memref<1x8x32xf32, #tpu.memory_space<vmem>>, vector<1x8x32xf32>
      %138 = vector.shape_cast %137 : vector<1x8x32xf32> to vector<8x32xf32>
      %139 = vector.shape_cast %136 : vector<8x32xf32> to vector<1x8x32xf32>
      tpu.vector_store %arg21[%c0_82, %c0_83, %c0_84], %139 {strides = array<i32>} : memref<1x8x32xf32, #tpu.memory_space<vmem>>, vector<1x8x32xf32>,
    } else {
    }
    %c0 = arith.constant 0 : index
    %c0_1 = arith.constant 0 : index
    %c0_2 = arith.constant 0 : index
    %3 = vector.load %arg21[%c0, %c0_1, %c0_2] : memref<1x8x32xf32, #tpu.memory_space<vmem>>, vector<1x8x32xf32>
    %4 = vector.shape_cast %3 : vector<1x8x32xf32> to vector<8x32xf32>
    %c0_3 = arith.constant 0 : index
    %c0_4 = arith.constant 0 : index
    %5 = vector.load %arg4[%c0_3, %c0_4] : memref<32x4xf32, #tpu.memory_space<vmem>>, vector<32x4xf32>
    %c0_5 = arith.constant 0 : index
    %c0_6 = arith.constant 0 : index
    %6 = vector.load %arg5[%c0_5, %c0_6] : memref<4x32xf32, #tpu.memory_space<vmem>>, vector<4x32xf32>
    %c0_7 = arith.constant 0 : index
    %c0_8 = arith.constant 0 : index
    %c0_9 = arith.constant 0 : index
    %7 = vector.load %arg17[%c0_7, %c0_8, %c0_9] : memref<1x1x32xf32, #tpu.memory_space<vmem>>, vector<1x1x32xf32>
    %8 = vector.shape_cast %7 : vector<1x1x32xf32> to vector<1x32xf32>
    %c0_10 = arith.constant 0 : index
    %c0_11 = arith.constant 0 : index
    %c0_12 = arith.constant 0 : index
    %9 = vector.load %arg18[%c0_10, %c0_11, %c0_12] : memref<1x1x32xf32, #tpu.memory_space<vmem>>, vector<1x1x32xf32>
    %10 = vector.shape_cast %9 : vector<1x1x32xf32> to vector<1x32xf32>
    %cst = arith.constant dense<0.000000e+00> : vector<8xf32>
    %11 = vector.multi_reduction <add>, %4, %cst [1] : vector<8x32xf32> to vector<8xf32>
    %12 = vector.shape_cast %11 : vector<8xf32> to vector<8x1xf32>
    %cst_13 = arith.constant 3.200000e+01 : f32
    %13 = vector.broadcast %cst_13 : f32 to vector<8x1xf32>
    %14 = arith.divf %12, %13 : vector<8x1xf32>
    %15 = vector.broadcast %14 : vector<8x1xf32> to vector<8x32xf32>
    %16 = arith.subf %4, %15 : vector<8x32xf32>
    %17 = arith.mulf %16, %16 : vector<8x32xf32>
    %cst_14 = arith.constant dense<0.000000e+00> : vector<8xf32>
    %18 = vector.multi_reduction <add>, %17, %cst_14 [1] : vector<8x32xf32> to vector<8xf32>
    %19 = vector.shape_cast %18 : vector<8xf32> to vector<8x1xf32>
    %cst_15 = arith.constant 3.200000e+01 : f32
    %20 = vector.broadcast %cst_15 : f32 to vector<8x1xf32>
    %21 = arith.divf %19, %20 : vector<8x1xf32>
    %22 = vector.broadcast %14 : vector<8x1xf32> to vector<8x32xf32>
    %23 = arith.subf %4, %22 : vector<8x32xf32>
    %cst_16 = arith.constant 9.99999974E-6 : f32
    %24 = vector.broadcast %cst_16 : f32 to vector<8x1xf32>
    %25 = arith.addf %21, %24 : vector<8x1xf32>
    %26 = math.rsqrt %25 : vector<8x1xf32>
    %27 = vector.broadcast %26 : vector<8x1xf32> to vector<8x32xf32>
    %28 = arith.mulf %23, %27 : vector<8x32xf32>
    %29 = vector.broadcast %8 : vector<1x32xf32> to vector<8x32xf32>
    %30 = arith.mulf %28, %29 : vector<8x32xf32>
    %31 = vector.broadcast %10 : vector<1x32xf32> to vector<8x32xf32>
    %32 = arith.addf %30, %31 : vector<8x32xf32>
    %33 = arith.truncf %32 : vector<8x32xf32> to vector<8x32xbf16>
    %c0_17 = arith.constant 0 : index
    %c0_18 = arith.constant 0 : index
    %c0_19 = arith.constant 0 : index
    %34 = vector.load %arg8[%c0_17, %c0_18, %c0_19] : memref<1x32x64xbf16, #tpu.memory_space<vmem>>, vector<1x32x64xbf16>
    %35 = vector.shape_cast %34 : vector<1x32x64xbf16> to vector<32x64xbf16>
    %cst_20 = arith.constant dense<0.000000e+00> : vector<8x64xf32>
    %36 = tpu.matmul %33, %35, %cst_20 {dimension_numbers = #tpu.dot_dimension_numbers<[1], [0], [0], [1], [0, 0, 1, 1], [], []>} : vector<8x32xbf16>, vector<32x64xbf16>, vector<8x64xf32> -> vector<8x64xf32>
    %c0_21 = arith.constant 0 : index
    %c0_22 = arith.constant 0 : index
    %c0_23 = arith.constant 0 : index
    %37 = vector.load %arg9[%c0_21, %c0_22, %c0_23] : memref<1x1x64xf32, #tpu.memory_space<vmem>>, vector<1x1x64xf32>
    %38 = vector.shape_cast %37 : vector<1x1x64xf32> to vector<1x64xf32>
    %39 = vector.broadcast %38 : vector<1x64xf32> to vector<8x64xf32>
    %40 = arith.addf %36, %39 : vector<8x64xf32>
    %41 = vector.extract_strided_slice %40 {offsets = [0, 0], sizes = [8, 32], strides = [1, 1]} : vector<8x64xf32> to vector<8x32xf32>
    %42 = vector.extract_strided_slice %40 {offsets = [0, 32], sizes = [8, 32], strides = [1, 1]} : vector<8x64xf32> to vector<8x32xf32>
    %43 = vector.extract_strided_slice %33 {offsets = [0, 0], sizes = [1, 32], strides = [1, 1]} : vector<8x32xbf16> to vector<1x32xbf16>
    %c0_24 = arith.constant 0 : index
    %c0_25 = arith.constant 0 : index
    %c0_26 = arith.constant 0 : index
    %44 = vector.load %arg6[%c0_24, %c0_25, %c0_26] : memref<1x32x32xbf16, #tpu.memory_space<vmem>>, vector<1x32x32xbf16>
    %45 = vector.shape_cast %44 : vector<1x32x32xbf16> to vector<32x32xbf16>
    %cst_27 = arith.constant dense<0.000000e+00> : vector<1x32xf32>
    %46 = tpu.matmul %43, %45, %cst_27 {dimension_numbers = #tpu.dot_dimension_numbers<[1], [0], [0], [1], [0, 0, 1, 1], [], []>} : vector<1x32xbf16>, vector<32x32xbf16>, vector<1x32xf32> -> vector<1x32xf32>
    %c0_28 = arith.constant 0 : index
    %c0_29 = arith.constant 0 : index
    %c0_30 = arith.constant 0 : index
    %47 = vector.load %arg7[%c0_28, %c0_29, %c0_30] : memref<1x1x32xf32, #tpu.memory_space<vmem>>, vector<1x1x32xf32>
    %48 = vector.shape_cast %47 : vector<1x1x32xf32> to vector<1x32xf32>
    %49 = arith.addf %46, %48 : vector<1x32xf32>
    %c0_31 = arith.constant 0 : index
    %c0_32 = arith.constant 0 : index
    %c0_33 = arith.constant 0 : index
    %50 = vector.load %arg3[%c0_31, %c0_32, %c0_33] : memref<1x8x1xi32, #tpu.memory_space<vmem>>, vector<1x8x1xi32>
    %51 = vector.shape_cast %50 : vector<1x8x1xi32> to vector<8x1xi32>
    %52 = tpu.iota {dimensions = array<i32: 1>} : vector<8x8xi32>
    %53 = vector.broadcast %51 : vector<8x1xi32> to vector<8x8xi32>
    %54 = arith.cmpi eq, %53, %52 : vector<8x8xi32>
    %55 = arith.extui %54 : vector<8x8xi1> to vector<8x8xi32>
    %56 = arith.sitofp %55 : vector<8x8xi32> to vector<8x8xf32>
    %c0_34 = arith.constant 0 : index
    %c0_35 = arith.constant 0 : index
    %c0_36 = arith.constant 0 : index
    %57 = vector.load %arg12[%c0_34, %c0_35, %c0_36] : memref<1x8x4xf32, #tpu.memory_space<vmem>>, vector<1x8x4xf32>
    %58 = vector.shape_cast %57 : vector<1x8x4xf32> to vector<8x4xf32>
    %cst_37 = arith.constant dense<0.000000e+00> : vector<8x4xf32>
    %59 = tpu.matmul %56, %58, %cst_37 {dimension_numbers = #tpu.dot_dimension_numbers<[1], [0], [0], [1], [0, 0, 1, 1], [], []>} : vector<8x8xf32>, vector<8x4xf32>, vector<8x4xf32> -> vector<8x4xf32>
    %60 = vector.broadcast %49 : vector<1x32xf32> to vector<8x32xf32>
    %61 = arith.mulf %41, %60 : vector<8x32xf32>
    %cst_38 = arith.constant dense<0.000000e+00> : vector<8x4xf32>
    %62 = tpu.matmul %61, %5, %cst_38 {dimension_numbers = #tpu.dot_dimension_numbers<[1], [0], [0], [1], [0, 0, 1, 1], [], []>} : vector<8x32xf32>, vector<32x4xf32>, vector<8x4xf32> -> vector<8x4xf32>
    %63 = arith.addf %62, %59 : vector<8x4xf32>
    %cst_39 = arith.constant dense<0xFF800000> : vector<4xf32>
    %64 = vector.multi_reduction <maximumf>, %63, %cst_39 [0] : vector<8x4xf32> to vector<4xf32>
    %65 = vector.shape_cast %64 : vector<4xf32> to vector<1x4xf32>
    %66 = vector.broadcast %65 : vector<1x4xf32> to vector<8x4xf32>
    %67 = arith.subf %63, %66 : vector<8x4xf32>
    %68 = math.exp %67 : vector<8x4xf32>
    %cst_40 = arith.constant dense<0.000000e+00> : vector<4xf32>
    %69 = vector.multi_reduction <add>, %68, %cst_40 [0] : vector<8x4xf32> to vector<4xf32>
    %70 = vector.shape_cast %69 : vector<4xf32> to vector<1x4xf32>
    %71 = tpu.reciprocal %70 {approx = true} : vector<1x4xf32> -> vector<1x4xf32>
    %72 = vector.broadcast %71 : vector<1x4xf32> to vector<8x4xf32>
    %73 = arith.mulf %68, %72 : vector<8x4xf32>
    %cst_41 = arith.constant dense<0.000000e+00> : vector<8x32xf32>
    %74 = tpu.matmul %73, %6, %cst_41 {dimension_numbers = #tpu.dot_dimension_numbers<[1], [0], [0], [1], [0, 0, 1, 1], [], []>} : vector<8x4xf32>, vector<4x32xf32>, vector<8x32xf32> -> vector<8x32xf32>
    %75 = arith.mulf %74, %42 : vector<8x32xf32>
    %cst_42 = arith.constant dense<0.000000e+00> : vector<32xf32>
    %76 = vector.multi_reduction <add>, %75, %cst_42 [0] : vector<8x32xf32> to vector<32xf32>
    %77 = vector.shape_cast %76 : vector<32xf32> to vector<1x32xf32>
    %78 = arith.truncf %77 : vector<1x32xf32> to vector<1x32xbf16>
    %c0_43 = arith.constant 0 : index
    %c0_44 = arith.constant 0 : index
    %c0_45 = arith.constant 0 : index
    %79 = vector.load %arg10[%c0_43, %c0_44, %c0_45] : memref<1x32x32xbf16, #tpu.memory_space<vmem>>, vector<1x32x32xbf16>
    %80 = vector.shape_cast %79 : vector<1x32x32xbf16> to vector<32x32xbf16>
    %cst_46 = arith.constant dense<0.000000e+00> : vector<1x32xf32>
    %81 = tpu.matmul %78, %80, %cst_46 {dimension_numbers = #tpu.dot_dimension_numbers<[1], [0], [0], [1], [0, 0, 1, 1], [], []>} : vector<1x32xbf16>, vector<32x32xbf16>, vector<1x32xf32> -> vector<1x32xf32>
    %c0_47 = arith.constant 0 : index
    %c0_48 = arith.constant 0 : index
    %c0_49 = arith.constant 0 : index
    %82 = vector.load %arg11[%c0_47, %c0_48, %c0_49] : memref<1x1x32xf32, #tpu.memory_space<vmem>>, vector<1x1x32xf32>
    %83 = vector.shape_cast %82 : vector<1x1x32xf32> to vector<1x32xf32>
    %84 = arith.addf %81, %83 : vector<1x32xf32>
    %85 = vector.broadcast %84 : vector<1x32xf32> to vector<8x32xf32>
    %86 = arith.addf %4, %85 : vector<8x32xf32>
    %c0_50 = arith.constant 0 : index
    %c0_51 = arith.constant 0 : index
    %c0_52 = arith.constant 0 : index
    %87 = vector.load %arg19[%c0_50, %c0_51, %c0_52] : memref<1x1x32xf32, #tpu.memory_space<vmem>>, vector<1x1x32xf32>
    %88 = vector.shape_cast %87 : vector<1x1x32xf32> to vector<1x32xf32>
    %c0_53 = arith.constant 0 : index
    %c0_54 = arith.constant 0 : index
    %c0_55 = arith.constant 0 : index
    %89 = vector.load %arg20[%c0_53, %c0_54, %c0_55] : memref<1x1x32xf32, #tpu.memory_space<vmem>>, vector<1x1x32xf32>
    %90 = vector.shape_cast %89 : vector<1x1x32xf32> to vector<1x32xf32>
    %cst_56 = arith.constant dense<0.000000e+00> : vector<8xf32>
    %91 = vector.multi_reduction <add>, %86, %cst_56 [1] : vector<8x32xf32> to vector<8xf32>
    %92 = vector.shape_cast %91 : vector<8xf32> to vector<8x1xf32>
    %cst_57 = arith.constant 3.200000e+01 : f32
    %93 = vector.broadcast %cst_57 : f32 to vector<8x1xf32>
    %94 = arith.divf %92, %93 : vector<8x1xf32>
    %95 = vector.broadcast %94 : vector<8x1xf32> to vector<8x32xf32>
    %96 = arith.subf %86, %95 : vector<8x32xf32>
    %97 = arith.mulf %96, %96 : vector<8x32xf32>
    %cst_58 = arith.constant dense<0.000000e+00> : vector<8xf32>
    %98 = vector.multi_reduction <add>, %97, %cst_58 [1] : vector<8x32xf32> to vector<8xf32>
    %99 = vector.shape_cast %98 : vector<8xf32> to vector<8x1xf32>
    %cst_59 = arith.constant 3.200000e+01 : f32
    %100 = vector.broadcast %cst_59 : f32 to vector<8x1xf32>
    %101 = arith.divf %99, %100 : vector<8x1xf32>
    %102 = vector.broadcast %94 : vector<8x1xf32> to vector<8x32xf32>
    %103 = arith.subf %86, %102 : vector<8x32xf32>
    %cst_60 = arith.constant 9.99999974E-6 : f32
    %104 = vector.broadcast %cst_60 : f32 to vector<8x1xf32>
    %105 = arith.addf %101, %104 : vector<8x1xf32>
    %106 = math.rsqrt %105 : vector<8x1xf32>
    %107 = vector.broadcast %106 : vector<8x1xf32> to vector<8x32xf32>
    %108 = arith.mulf %103, %107 : vector<8x32xf32>
    %109 = vector.broadcast %88 : vector<1x32xf32> to vector<8x32xf32>
    %110 = arith.mulf %108, %109 : vector<8x32xf32>
    %111 = vector.broadcast %90 : vector<1x32xf32> to vector<8x32xf32>
    %112 = arith.addf %110, %111 : vector<8x32xf32>
    %113 = arith.truncf %112 : vector<8x32xf32> to vector<8x32xbf16>
    %c0_61 = arith.constant 0 : index
    %c0_62 = arith.constant 0 : index
    %c0_63 = arith.constant 0 : index
    %114 = vector.load %arg13[%c0_61, %c0_62, %c0_63] : memref<1x32x64xbf16, #tpu.memory_space<vmem>>, vector<1x32x64xbf16>
    %115 = vector.shape_cast %114 : vector<1x32x64xbf16> to vector<32x64xbf16>
    %cst_64 = arith.constant dense<0.000000e+00> : vector<8x64xf32>
    %116 = tpu.matmul %113, %115, %cst_64 {dimension_numbers = #tpu.dot_dimension_numbers<[1], [0], [0], [1], [0, 0, 1, 1], [], []>} : vector<8x32xbf16>, vector<32x64xbf16>, vector<8x64xf32> -> vector<8x64xf32>
    %c0_65 = arith.constant 0 : index
    %c0_66 = arith.constant 0 : index
    %c0_67 = arith.constant 0 : index
    %117 = vector.load %arg14[%c0_65, %c0_66, %c0_67] : memref<1x1x64xf32, #tpu.memory_space<vmem>>, vector<1x1x64xf32>
    %118 = vector.shape_cast %117 : vector<1x1x64xf32> to vector<1x64xf32>
    %119 = vector.broadcast %118 : vector<1x64xf32> to vector<8x64xf32>
    %120 = arith.addf %116, %119 : vector<8x64xf32>
    %cst_68 = arith.constant 0.000000e+00 : f32
    %121 = vector.broadcast %cst_68 : f32 to vector<8x64xf32>
    %122 = arith.maximumf %120, %121 : vector<8x64xf32>
    %123 = arith.truncf %122 : vector<8x64xf32> to vector<8x64xbf16>
    %c0_69 = arith.constant 0 : index
    %c0_70 = arith.constant 0 : index
    %c0_71 = arith.constant 0 : index
    %124 = vector.load %arg15[%c0_69, %c0_70, %c0_71] : memref<1x64x32xbf16, #tpu.memory_space<vmem>>, vector<1x64x32xbf16>
    %125 = vector.shape_cast %124 : vector<1x64x32xbf16> to vector<64x32xbf16>
    %cst_72 = arith.constant dense<0.000000e+00> : vector<8x32xf32>
    %126 = tpu.matmul %123, %125, %cst_72 {dimension_numbers = #tpu.dot_dimension_numbers<[1], [0], [0], [1], [0, 0, 1, 1], [], []>} : vector<8x64xbf16>, vector<64x32xbf16>, vector<8x32xf32> -> vector<8x32xf32>
    %c0_73 = arith.constant 0 : index
    %c0_74 = arith.constant 0 : index
    %c0_75 = arith.constant 0 : index
    %127 = vector.load %arg16[%c0_73, %c0_74, %c0_75] : memref<1x1x32xf32, #tpu.memory_space<vmem>>, vector<1x1x32xf32>
    %128 = vector.shape_cast %127 : vector<1x1x32xf32> to vector<1x32xf32>
    %129 = vector.broadcast %128 : vector<1x32xf32> to vector<8x32xf32>
    %130 = arith.addf %126, %129 : vector<8x32xf32>
    %131 = arith.addf %86, %130 : vector<8x32xf32>
    %c0_76 = arith.constant 0 : index
    %c0_77 = arith.constant 0 : index
    %c0_78 = arith.constant 0 : index
    %132 = vector.load %arg21[%c0_76, %c0_77, %c0_78] : memref<1x8x32xf32, #tpu.memory_space<vmem>>, vector<1x8x32xf32>
    %133 = vector.shape_cast %132 : vector<1x8x32xf32> to vector<8x32xf32>
    %134 = vector.shape_cast %131 : vector<8x32xf32> to vector<1x8x32xf32>
    tpu.vector_store %arg21[%c0_76, %c0_77, %c0_78], %134 {strides = array<i32>} : memref<1x8x32xf32, #tpu.memory_space<vmem>>, vector<1x8x32xf32>,
    return
  }
  func.func @transform_0(%arg0: i32, %arg1: i32) -> (i32, i32, i32) {
    %c0_i32 = arith.constant 0 : i32
    %c0_i32_0 = arith.constant 0 : i32
    %c0_i32_1 = arith.constant 0 : i32
    return %arg0, %c0_i32, %c0_i32_0 : i32, i32, i32
  }
  func.func @transform_1(%arg0: i32, %arg1: i32) -> (i32, i32, i32) {
    %c0_i32 = arith.constant 0 : i32
    %c0_i32_0 = arith.constant 0 : i32
    %c0_i32_1 = arith.constant 0 : i32
    return %arg0, %c0_i32, %c0_i32_0 : i32, i32, i32
  }
  func.func @transform_2(%arg0: i32, %arg1: i32) -> (i32, i32) {
    %c0_i32 = arith.constant 0 : i32
    %c0_i32_0 = arith.constant 0 : i32
    %c0_i32_1 = arith.constant 0 : i32
    return %c0_i32, %c0_i32_0 : i32, i32
  }
  func.func @transform_3(%arg0: i32, %arg1: i32) -> (i32, i32) {
    %c0_i32 = arith.constant 0 : i32
    %c0_i32_0 = arith.constant 0 : i32
    %c0_i32_1 = arith.constant 0 : i32
    return %c0_i32, %c0_i32_0 : i32, i32
  }
  func.func @transform_4(%arg0: i32, %arg1: i32) -> (i32, i32, i32) {
    %c0_i32 = arith.constant 0 : i32
    %c0_i32_0 = arith.constant 0 : i32
    %c0_i32_1 = arith.constant 0 : i32
    return %arg1, %c0_i32, %c0_i32_0 : i32, i32, i32
  }
  func.func @transform_5(%arg0: i32, %arg1: i32) -> (i32, i32, i32) {
    %c0_i32 = arith.constant 0 : i32
    %c0_i32_0 = arith.constant 0 : i32
    %c0_i32_1 = arith.constant 0 : i32
    return %arg1, %c0_i32, %c0_i32_0 : i32, i32, i32
  }
  func.func @transform_6(%arg0: i32, %arg1: i32) -> (i32, i32, i32) {
    %c0_i32 = arith.constant 0 : i32
    %c0_i32_0 = arith.constant 0 : i32
    %c0_i32_1 = arith.constant 0 : i32
    return %arg1, %c0_i32, %c0_i32_0 : i32, i32, i32
  }
  func.func @transform_7(%arg0: i32, %arg1: i32) -> (i32, i32, i32) {
    %c0_i32 = arith.constant 0 : i32
    %c0_i32_0 = arith.constant 0 : i32
    %c0_i32_1 = arith.constant 0 : i32
    return %arg1, %c0_i32, %c0_i32_0 : i32, i32, i32
  }
  func.func @transform_8(%arg0: i32, %arg1: i32) -> (i32, i32, i32) {
    %c0_i32 = arith.constant 0 : i32
    %c0_i32_0 = arith.constant 0 : i32
    %c0_i32_1 = arith.constant 0 : i32
    return %arg1, %c0_i32, %c0_i32_0 : i32, i32, i32
  }
  func.func @transform_9(%arg0: i32, %arg1: i32) -> (i32, i32, i32) {
    %c0_i32 = arith.constant 0 : i32
    %c0_i32_0 = arith.constant 0 : i32
    %c0_i32_1 = arith.constant 0 : i32
    return %arg1, %c0_i32, %c0_i32_0 : i32, i32, i32
  }
  func.func @transform_10(%arg0: i32, %arg1: i32) -> (i32, i32, i32) {
    %c0_i32 = arith.constant 0 : i32
    %c0_i32_0 = arith.constant 0 : i32
    %c0_i32_1 = arith.constant 0 : i32
    return %arg1, %c0_i32, %c0_i32_0 : i32, i32, i32
  }
  func.func @transform_11(%arg0: i32, %arg1: i32) -> (i32, i32, i32) {
    %c0_i32 = arith.constant 0 : i32
    %c0_i32_0 = arith.constant 0 : i32
    %c0_i32_1 = arith.constant 0 : i32
    return %arg1, %c0_i32, %c0_i32_0 : i32, i32, i32
  }
  func.func @transform_12(%arg0: i32, %arg1: i32) -> (i32, i32, i32) {
    %c0_i32 = arith.constant 0 : i32
    %c0_i32_0 = arith.constant 0 : i32
    %c0_i32_1 = arith.constant 0 : i32
    return %arg1, %c0_i32, %c0_i32_0 : i32, i32, i32
  }
  func.func @transform_13(%arg0: i32, %arg1: i32) -> (i32, i32, i32) {
    %c0_i32 = arith.constant 0 : i32
    %c0_i32_0 = arith.constant 0 : i32
    %c0_i32_1 = arith.constant 0 : i32
    return %arg1, %c0_i32, %c0_i32_0 : i32, i32, i32
  }
  func.func @transform_14(%arg0: i32, %arg1: i32) -> (i32, i32, i32) {
    %c0_i32 = arith.constant 0 : i32
    %c0_i32_0 = arith.constant 0 : i32
    %c0_i32_1 = arith.constant 0 : i32
    return %arg1, %c0_i32, %c0_i32_0 : i32, i32, i32
  }
  func.func @transform_15(%arg0: i32, %arg1: i32) -> (i32, i32, i32) {
    %c0_i32 = arith.constant 0 : i32
    %c0_i32_0 = arith.constant 0 : i32
    %c0_i32_1 = arith.constant 0 : i32
    return %arg1, %c0_i32, %c0_i32_0 : i32, i32, i32
  }
  func.func @transform_16(%arg0: i32, %arg1: i32) -> (i32, i32, i32) {
    %c0_i32 = arith.constant 0 : i32
    %c0_i32_0 = arith.constant 0 : i32
    %c0_i32_1 = arith.constant 0 : i32
    return %arg1, %c0_i32, %c0_i32_0 : i32, i32, i32
  }
  func.func @transform_17(%arg0: i32, %arg1: i32) -> (i32, i32, i32) {
    %c0_i32 = arith.constant 0 : i32
    %c0_i32_0 = arith.constant 0 : i32
    %c0_i32_1 = arith.constant 0 : i32
    return %arg1, %c0_i32, %c0_i32_0 : i32, i32, i32
  }
  func.func @transform_18(%arg0: i32, %arg1: i32) -> (i32, i32, i32) {
    %c0_i32 = arith.constant 0 : i32
    %c0_i32_0 = arith.constant 0 : i32
    %c0_i32_1 = arith.constant 0 : i32
    return %arg1, %c0_i32, %c0_i32_0 : i32, i32, i32
  }
  func.func @transform_19(%arg0: i32, %arg1: i32) -> (i32, i32, i32) {
    %c0_i32 = arith.constant 0 : i32
    %c0_i32_0 = arith.constant 0 : i32
    %c0_i32_1 = arith.constant 0 : i32
    return %arg0, %c0_i32, %c0_i32_0 : i32, i32, i32
  }
}

</mosaic_0001>

<bundles_post_ra>
// kernel: tpu_custom_call.1
= control target key start
LH: loop header
LB: loop body
LE: loop exit
PB: predicated region body
PF: predicated region fallthrough
CT: control target
= control target key end

     0   :  { %s2752_s0 = inlined_call_operand.hbm [shape: f32[2,8,32], index: 0, kind: input, shape index: {}]   ;;  %s2753_s1 = inlined_call_operand.vmem [shape: s32[2,8,1], index: 1, kind: input, shape index: {}]   ;;  %s2754_s2 = inlined_call_operand.vmem [shape: f32[32,4], index: 2, kind: input, shape index: {}]   ;;  %s2755_s3 = inlined_call_operand.vmem [shape: f32[4,32], index: 3, kind: input, shape index: {}]   ;;  %s2756_s4 = inlined_call_operand.vmem [shape: bf16[2,32,32], index: 4, kind: input, shape index: {}]   ;;  %s2757_s5 = inlined_call_operand.vmem [shape: f32[2,1,32], index: 5, kind: input, shape index: {}]   ;;  %s2758_s6 = inlined_call_operand.vmem [shape: bf16[2,32,64], index: 6, kind: input, shape index: {}]   ;;  %s2759_s7 = inlined_call_operand.vmem [shape: f32[2,1,64], index: 7, kind: input, shape index: {}]   ;;  %s2760_s8 = inlined_call_operand.vmem [shape: bf16[2,32,32], index: 8, kind: input, shape index: {}]   ;;  %s2761_s9 = inlined_call_operand.vmem [shape: f32[2,1,32], index: 9, kind: input, shape index: {}]   ;;  %s2762_s10 = inlined_call_operand.vmem [shape: f32[2,8,4], index: 10, kind: input, shape index: {}]   ;;  %s2763_s11 = inlined_call_operand.vmem [shape: bf16[2,32,64], index: 11, kind: input, shape index: {}]   ;;  %s2764_s12 = inlined_call_operand.vmem [shape: f32[2,1,64], index: 12, kind: input, shape index: {}]   ;;  %s2765_s13 = inlined_call_operand.vmem [shape: bf16[2,64,32], index: 13, kind: input, shape index: {}]   ;;  %s2766_s14 = inlined_call_operand.vmem [shape: f32[2,1,32], index: 14, kind: input, shape index: {}]   ;;  %s2767_s15 = inlined_call_operand.vmem [shape: f32[2,1,32], index: 15, kind: input, shape index: {}]   ;;  %s2768_s16 = inlined_call_operand.vmem [shape: f32[2,1,32], index: 16, kind: input, shape index: {}]   ;;  %s2769_s17 = inlined_call_operand.vmem [shape: f32[2,1,32], index: 17, kind: input, shape index: {}]   ;;  %s2770_s18 = inlined_call_operand.vmem [shape: f32[2,1,32], index: 18, kind: input, shape index: {}]   ;;  %s2771_s19 = inlined_call_operand.hbm [shape: f32[2,8,32], index: 19, kind: output, shape index: {}]  }
   0x1   :  { %2792 = sst [smem:[#allocation22_spill]] %s2752_s0 }
   0x2   :  { %2793 = sst [smem:[#allocation23_spill]] %s2753_s1 }
   0x3   :  { %2794 = sst [smem:[#allocation24_spill]] %s2754_s2 }
   0x4   :  { %2795 = sst [smem:[#allocation25_spill]] %s2755_s3 }
   0x5   :  { %2796 = sst [smem:[#allocation26_spill]] %s2756_s4 }
   0x6   :  { %2797 = sst [smem:[#allocation27_spill]] %s2757_s5 }
   0x7   :  { %2798 = sst [smem:[#allocation28_spill]] %s2758_s6 }
   0x8   :  { %2799 = sst [smem:[#allocation29_spill]] %s2760_s8 }
   0x9   :  { %2800 = sst [smem:[#allocation30_spill]] %s2761_s9 }
   0xa   :  { %2801 = sst [smem:[#allocation31_spill]] %s2762_s10 }
   0xb   :  { %2802 = sst [smem:[#allocation32_spill]] %s2763_s11 }
   0xc   :  { %2803 = sst [smem:[#allocation33_spill]] %s2764_s12 }
   0xd   :  { %2804 = sst [smem:[#allocation34_spill]] %s2765_s13 }
   0xe   :  { %2805 = sst [smem:[#allocation35_spill]] %s2766_s14 }
   0xf   :  { %2806 = sst [smem:[#allocation36_spill]] %s2767_s15 }
  0x10   :  { %2807 = sst [smem:[#allocation37_spill]] %s2768_s16 }
  0x11   :  { %2808 = sst [smem:[#allocation38_spill]] %s2769_s17 }
  0x12   :  { %2809 = sst [smem:[#allocation39_spill]] %s2770_s18 }
  0x13   :  { %2810 = sst [smem:[#allocation40_spill]] %s2771_s19 }
  0x14   :  { %24 = vsyncpa [#allocation3], 0 }
  0x15   :  { %26 = vsyncpa [#allocation3 + $0x1], 0 }
  0x16   :  { %27 = vsyncpa [#allocation4], 0 }
  0x17   :  { %29 = vsyncpa [#allocation4 + $0x1], 0  ;;  %s2340_s0 = smov 0   ;;  %s2342_s30 = smov 0  }
  0x18   :  { %s2344_s20 = smov 0   ;;  %s2346_s21 = smov 0  }
  0x19   :  { %s2348_s1 = smov 0   ;;  %s2350_s22 = smov 0  }
  0x1a   :  { %s2352_s2 = smov 0   ;;  %s2354_s23 = smov 0  }
  0x1b LB: > { %2811 = sst [smem:[#allocation8_spill]] %s2203_s0  ;;  %s1839_s24 = sadd.s32 4294967295, %s2231_s23   ;;  %s2231_s23 = sphi %s2354_s23, %s35_s23   ;;  %s2227_s2 = sphi %s2352_s2, %s2880_s2   ;;  %s2223_s22 = sphi %s2350_s22, %s2879_s22   ;;  %s2219_s1 = sphi %s2348_s1, %s2878_s1   ;;  %s2215_s21 = sphi %s2346_s21, %s2877_s21   ;;  %s2211_s20 = sphi %s2344_s20, %s2876_s20   ;;  %s2207_s30 = sphi %s2342_s30, %s2875_s30   ;;  %s2203_s0 = sphi %s2340_s0, %s2874_s0  }
  0x1c   : > { %2812 = sst [smem:[#allocation9_spill]] %s2207_s30  ;;  %s1840_s25 = sadd.s32 4294967294, %s2231_s23  }
  0x1d   : > { %2813 = sst [smem:[#allocation10_spill]] %s2211_s20  ;;  %s44_s3 = sadd.s32 1, %s2223_s22 }
  0x1e   : > { %2814 = sst [smem:[#allocation11_spill]] %s2219_s1  ;;  %s47_s26 = sadd.s32 1, %s2227_s2 }
  0x1f   : > { %2815 = sst [smem:[#allocation12_spill]] %s2223_s22  ;;  %p45_p0 = scmp.ge.s32.totalorder %s44_s3, 2 }
  0x20   : > { %2816 = sst [smem:[#allocation13_spill]] %s2227_s2  ;;  %s54_s27 = sadd.s32 1, %s2211_s20 }
  0x21   : > { %2817 = sst [smem:[#allocation14_spill]] %s2231_s23  ;;  %p61_p1 = scmp.ne.s32.totalorder %s2211_s20, %s2207_s30 }
  0x22   : > { %p62_p2 = scmp.eq.s32.totalorder %s2231_s23, 0  ;;  %s2882_s3 = smov (%p45_p0, %s44_s3), 0 }
  0x23   : > { %2818 = sst [smem:[#allocation15_spill]] %s2882_s3  ;;  %s2884_s26 = smov (!%p45_p0, %s47_s26), %s2227_s2 }
  0x24   : > { %p2391_p3 = por %p62_p2, %p61_p1  ;;  %p67_p4 = scmp.ne.s32.totalorder %s2207_s30, %s2203_s0 }
  0x25   : > { %p49_p5 = scmp.ge.s32.totalorder %s2884_s26, 2  ;;  %p68_p6 = scmp.eq.s32.totalorder %s1839_s24, 0 }
  0x26   : > { %p549_p7 = scmp.eq.s32.totalorder %s1839_s24, 3  ;;  %p555_p8 = scmp.eq.s32.totalorder %s1840_s25, 3 }
  0x27   : > { %s2886_s26 = smov (%p49_p5, %s2884_s26), 0  ;;  %p2399_p9 = por %p68_p6, %p67_p4 }
  0x28   : > { %2820 = sst [smem:[#allocation16_spill]] %s2886_s26  ;;  %p2403_p10 = por %p549_p7, %p61_p1 }
  0x29   : > { %s51_s22 = ssub.s32 %s2227_s2, %s2886_s26  ;;  %p2409_p11 = por %p555_p8, %p67_p4 }
  0x2a   : > { %s2822_s3 = scalar_select %p2403_p10, 1, 0 }
  0x2b   : > { %s2824_s0 = scalar_select %p2409_p11, 1, 0 }
  0x2c   : > { %2823 = sst [smem:[#allocation17_spill]] %s2822_s3  ;;  %p52_p12 = scmp.eq.s32.totalorder %s51_s22, 0 }
  0x2d   : > { %2825 = sst [smem:[#allocation18_spill]] %s2824_s0  ;;  %p2010_p13 = scmp.lt.s32.totalorder %s2231_s23, 4 }
  0x2e   : > { %s581_s24 = sand.u32 1, %s2211_s20   ;;  %s1844_s18 = sshll.u32 %s2227_s2, 7 }
  0x2f   : > { %s2416_s25 = scalar_select %p52_p12, %s2211_s20, %s54_s27  }
  0x30   : > { %s1843_s19 = sshll.u32 %s581_s24, 3  ;;  %s2827_s15 = sld [smem:[#allocation22_spill]] }
  0x31   : > { %2826 = sst [smem:[#allocation19_spill]] %s2416_s25  ;;  %s585_s26 = scalar_lea.vmem [#allocation2], %s1843_s19 }
  0x32   : > { %s592_s3 = sshll.u32 %s585_s26, 4  ;;  %p2428_p0 = pnand %p2010_p13, %p2391_p3  ;;  %s2424_s3 = int_to_ptr.vmem [resolvable:$true] %s592_s3 }
  0x33   : > { %s582_s16 = scalar_lea.sflag [#allocation3], %s581_s24 }
  0x34   : > { %p2105_p5 = pneg %p2428_p0 }
  0x36   : > { %s2422_s13 = scalar_lea.hbm %s2827_s15, %s1844_s18  ;;  %s2108_s26 = scalar_lea.hbm %s2827_s15, 256 }
  0x37   : > { %s2103_s17 = scalar_lea.hbm %s2422_s13, 128  ;;  %p2109_p3 = scmp.lt.u32.totalorder %s2422_s13, %s2827_s15 }
  0x38   : > { %p2104_p4 = scmp.ne.s32.totalorder %s2422_s13, %s2103_s17  ;;  %p2110_p8 = scmp.lt.u32.totalorder %s2108_s26, %s2103_s17 }
  0x39   : > { %p2112_p13 = scmp.lt.u32.totalorder %s2103_s17, %s2422_s13 }
  0x3a   : > { %p2106_p6 = pnand %p2105_p5, %p2104_p4  ;;  %p2111_p12 = por %p2110_p8, %p2109_p3 }
  0x3c   : > { %p2107_p7 = pneg %p2106_p6  ;;  %p2113_p1 = por %p2112_p13, %p2111_p12 }
  0x3e   : > { %p2114_p2 = pnand %p2113_p1, %p2107_p7 }
  0x40   : > { %2117 = shalt.err (!%p2114_p2)
}
  0x41   : > { %s2118_s24 = scalar_lea.vmem %s2424_s3, 128  ;;  %s2233_s18 = smov [#allocation2]  }
  0x42   : > { %p2119_p4 = scmp.ne.s32.totalorder %s2424_s3, %s2118_s24  ;;  %s2123_s19 = sshll.u32 %s2233_s18, 4  ;;  %s2124_s19 = int_to_ptr.vmem [resolvable:$false] %s2123_s19 }
  0x43   : > { %s2125_s27 = scalar_lea.vmem %s2124_s19, 256  ;;  %p2126_p10 = scmp.lt.s32.totalorder %s2424_s3, %s2124_s19 }
  0x44   : > { %p2121_p6 = pnand %p2119_p4, %p2105_p5  ;;  %p2127_p3 = scmp.lt.s32.totalorder %s2125_s27, %s2118_s24 }
  0x46   : > { %p2122_p11 = pneg %p2121_p6  ;;  %p2128_p8 = por %p2127_p3, %p2126_p10 }
  0x48   : > { %p2129_p12 = pnand %p2128_p8, %p2122_p11 }
  0x4a   : > { %2132 = shalt.err (!%p2129_p12)
}
  0x4b   : > { %2005 = dma.hbm_to_vmem [thread:$0]  (!%p2428_p0), %s2422_s13, 128, %s2424_s3, %s582_s16  }
  0x4c   : > { %p2829_p1 = scmp.lt.s32.totalorder %s2231_s23, 5  ;;  %p2830_p2 = scmp.ge.s32.totalorder %s2231_s23, 1 }
  0x4e   : > { %p706_p5 = pnand %p2830_p2, %p2829_p1 }
  0x50   : > { %709 = sbr.rel (%p706_p5) target bundleno = 2126 (0x84e), region = 96 }
  0x57   : > { %s2464_s17 = sand.u32 1, %s2207_s30  }
  0x58   : > { %s2781_s26 = sshll.u32 %s2464_s17, 3  ;;  %s712_s28 = scalar_lea.sflag [#allocation3], %s2464_s17 }
  0x59   : > { %s715_s22 = scalar_lea.vmem [#allocation2], %s2781_s26 }
  0x5a   : > { %2194 = dma.done.wait (%p2399_p9), %s712_s28, 128  }
  0x5b   : > { %2196 = vsyncadd (%p2399_p9), %s712_s28, 4294967168  ;;  %p830_p10 = scmp.lt.s32.totalorder %s2219_s1, 1  ;;  %p834_p11 = scmp.lt.s32.totalorder %s2215_s21, 1 }
  0x5c   : > { %s2831_s18 = sld [smem:[#allocation23_spill]]  ;;  %s2832_s4 = sld [smem:[#allocation26_spill]] }
  0x5d   : > { %s831_s13 = scalar_select %p830_p10, %s2219_s1, 1 }
  0x5e   : > { %s2478_s3 = scalar_select %p834_p11, %s2215_s21, 1 }
  0x5f   : > { %s1848_s16 = sshll.u32 %s831_s13, 3  ;;  %s2834_s6 = sld [smem:[#allocation28_spill]] }
  0x60   : > { %s1894_s27 = sshll.u32 %s2478_s3, 4  ;;  %s2835_s8 = sld [smem:[#allocation29_spill]] }
  0x61   : > { %s1855_s25 = sshll.u32 %s2478_s3, 3  ;;  %s2838_s11 = sld [smem:[#allocation32_spill]] }
  0x62   : > { %s2483_s19 = scalar_lea.vmem %s2831_s18, %s1848_s16  ;;  %s2489_s15 = scalar_lea.vmem %s2832_s4, %s1894_s27 }
  0x63   : > { %s2840_s10 = sld [smem:[#allocation31_spill]]  ;;  %s1898_s26 = sshll.u32 %s2478_s3, 5 }
  0x64   : > { %s2843_s9 = sld [smem:[#allocation34_spill]]  ;;  %s2846_s0 = sld [smem:[#allocation38_spill]] }
  0x65   : > { %s2498_s29 = scalar_lea.vmem %s2834_s6, %s1894_s27  ;;  %s2848_s14 = sshll.u32 %s2464_s17, 3 }
  0x66   : > { %s2507_s28 = scalar_lea.vmem %s2835_s8, %s1894_s27  ;;  %s2556_s2 = scalar_lea.vmem [#allocation5], %s2848_s14 }
  0x67   : > { %2836 = sst [smem:[#allocation20_spill]] %s2507_s28  ;;  %s2517_s30 = scalar_lea.vmem %s2838_s11, %s1894_s27 }
  0x68   : > { %2839 = sst [smem:[#allocation21_spill]] %s2517_s30  ;;  %s2844_s11 = sld [smem:[#allocation36_spill]] }
  0x69   : > { %s2522_s16 = scalar_lea.vmem %s2840_s10, %s1855_s25  ;;  %s2845_s10 = sld [smem:[#allocation37_spill]] }
  0x6a   : > { %s2536_s20 = scalar_lea.vmem %s2843_s9, %s1898_s26  ;;  %s886_s12 = scalar_lea.vmem %s2846_s0, %s2478_s3 }
  0x6b   : > { %s2847_s28 = sld [smem:[#allocation39_spill]]  ;;  %p1860_p9 = scmp.ne.s32.totalorder %s2215_s21, 0 }
  0x6c   : > { %v895_v0 = vld [vmem:[%s715_s22] sm:$0xff] (!%p1860_p9)  ;;  %vm896_vm0 = vcmask (!%p1860_p9), 261120  }
  0x6d   : > { %894 = sbr.rel (%p1860_p9) target bundleno = 116 (0x74), region = 104  ;;  %897 = vst.msk [vmem:[%s2556_s2] sm:$0xff] (!%p1860_p9), %vm896_vm0, %v895_v0 }
  0x6e   : > { %s880_s6 = scalar_lea.vmem %s2844_s11, %s2478_s3 }
  0x6f   : > { %s883_s30 = scalar_lea.vmem %s2845_s10, %s2478_s3 }
  0x71   : > { %s889_s4 = scalar_lea.vmem %s2847_s28, %s2478_s3 }
  0x74 PF: > { %v2561_v1 = vld [vmem:[%s2556_s2] sm:$0xff]  ;;  %vm906_vm1 = vcmask 261120   ;;  %v2083_v8 = vld [vmem:[%s2498_s29] sm:$0xff]   ;;  %v2234_v10 = vmov 0.0   ;;  %v2085_v11 = vld [vmem:[%s2498_s29 + $0x8] sm:$0xff]   ;;  %vm2235_vm2 = vmmov 0   ;;  %v1060_v23 = vlaneseq }
  0x75   : > { %v907_v2 = vsel %vm906_vm1, %v2561_v1, 0.0  ;;  %v2084_v9 = vld [vmem:[%s2489_s15] sm:$0xff]   ;;  %1925 = vmatprep.subr.bf16.mxu0 %v2234_v10  ;;  %1933 = vmatprep.subr.bf16.mxu1 %v2234_v10  ;;  %v2086_v12 = vld [vmem:[%s2489_s15 + $0x8] sm:$0xff]   ;;  %v2236_v14 = vmov 0   ;;  %v2237_v29 = vmov 0.0|0.0   ;;  %vm1069_vm4 = vcmask 64512  }
  0x76   : > { %908 = vadd.xlane.f32.xlu0 %v907_v2  ;;  %1926 = vmatpush3.bf16.msra.mxu0 %v2083_v8  ;;  %v1059_v13 = vld [vmem:[%s2483_s19] sm:$0xff]  ;;  %v1061_v27 = vand.u32 127, %v1060_v23  ;;  %s2851_s19 = sld [smem:[#allocation24_spill]]  ;;  %v2615_v37 = vshrl.u32 %v1060_v23, 7  ;;  %s2853_s18 = sld [smem:[#allocation27_spill]]  ;;  %vm1244_vm5 = vcmask 1043456  }
  0x77   : > { %1934 = vmatpush3.bf16.msra.mxu1 %v2084_v9  ;;  %1927 = vmatprep.subr.bf16.mxu0 %v2234_v10  ;;  %v1861_v19 = vld [vmem:[%s880_s6] ss:$0 sm:$0xff]  ;;  %s2852_s6 = scalar_lea.vmem %s2759_s7, %s2478_s3  ;;  %s2238_s8 = smov 96   ;;  %vm1221_vm6 = vcmask 31744   ;;  %vm1533_vm7 = vcmask 523264  }
  0x78   : > { %1935 = vmatprep.subr.bf16.mxu1 %v2234_v10  ;;  %1929 = vmatprep.mubr.msk.bf16.mxu0 %vm2235_vm2, %v2234_v10  ;;  %v1862_v21 = vld [vmem:[%s883_s30] ss:$0 sm:$0xff]  ;;  %v1145_v40 = vsub.s32 0, %v2615_v37  ;;  %s2855_s9 = sld [smem:[#allocation25_spill]]  ;;  %s2856_s10 = sld [smem:[#allocation20_spill]] }
  0x79   : > { %1937 = vmatprep.mubr.msk.bf16.mxu1 %vm2235_vm2, %v2234_v10  ;;  %2081 = vset.pattern.permute.xlu1 %v2236_v14  ;;  %v1068_v26 = vld [vmem:[%s2522_s16] sm:$0xff]  ;;  %s2857_s15 = sld [smem:[#allocation30_spill]]  ;;  %s2862_s1 = sld [smem:[#allocation11_spill]] }
  0x7a   : > { %1928 = vmatpush3.bf16.msra.mxu0 %v2085_v11  ;;  %2082 = vset.pattern.permute.xlu0 %v2236_v14  ;;  %v1863_v38 = vld [vmem:[%s2852_s6] ss:$0 sm:$0xff]  ;;  %s2859_s22 = sld [smem:[#allocation21_spill]]  ;;  %s2863_s6 = sld [smem:[#allocation33_spill]] }
  0x7b   : > { %1936 = vmatpush3.bf16.msra.mxu1 %v2086_v12  ;;  %1941 = vmatprep.subr.mxu0 %v2234_v10  ;;  %s1593_s28 = sshll.u32 %s2556_s2, 4  ;;  %s2698_s28 = int_to_ptr.vmem [resolvable:$true] %s1593_s28 }
  0x7c   : > { %1962 = vmatprep.subr.bf16.mxu1 %v2234_v10  ;;  %1063 = vperm.xlu1 %2081, %v1059_v13   ;;  %v899_v30 = vld [vmem:[%s2851_s19] sm:$0xff]  ;;  %v900_v31 = vld [vmem:[%s2851_s19 + $0x8] sm:$0xff]  ;;  %v901_v34 = vld [vmem:[%s2851_s19 + $0x10] sm:$0xff]  ;;  %s2854_s24 = scalar_lea.vmem %s2853_s18, %s2478_s3  ;;  %s2133_s14 = scalar_lea.vmem %s2698_s28, 128 }
  0x7d   : > { %v1991_v33 = vpack.c.bf16 %v900_v31, %v899_v30  ;;  %v902_v35 = vld [vmem:[%s2851_s19 + $0x18] sm:$0xff]  ;;  %v1006_v39 = vld [vmem:[%s2854_s24] sm:$0x1]  ;;  %s2867_s24 = sld [smem:[#allocation17_spill]]  ;;  %p2134_p0 = scmp.ne.s32.totalorder %s2698_s28, %s2133_s14 }
  0x7e   : > { %v1994_v36 = vpack.c.bf16 %v902_v35, %v901_v34  ;;  %v903_v53 = vld [vmem:[%s2855_s9] sm:$0xf]  ;;  %v2088_v14 = vld [vmem:[%s2856_s10 + $0x8] sm:$0xff]  }
  0x7f   : > { %v2087_v13 = vld [vmem:[%s2856_s10] sm:$0xff]   ;;  %s2858_s21 = scalar_lea.vmem %s2857_s15, %s2478_s3  ;;  %s2868_s10 = sld [smem:[#allocation40_spill]] }
  0x80   : > { %v2090_v37 = vld [vmem:[%s2859_s22 + $0x8] sm:$0xff]   ;;  %s2864_s25 = scalar_lea.vmem %s2863_s6, %s2478_s3  ;;  %s2239_s15 = smov [#allocation5]  }
  0x83   : > { %p2869_p7 = scmp.ne.s32.totalorder %s2867_s24, 0 }
  0x85   : > { %p2135_p13 = pnand %p2134_p0, %p2869_p7 }
  0x87   : > { %p2136_p4 = pneg %p2135_p13 }
  0xfb   : > { %v1064_v28 = vpop.permute.xlu1 %1063 }
  0xfc   : > { %vm1065_vm3 = vcmp.eq.s32.totalorder %v1064_v28, %v1061_v27  ;;  %v1335_v27 = vld [vmem:[%s2858_s21] sm:$0x1]  ;;  %s2137_s21 = sshll.u32 %s2239_s15, 4  ;;  %s2138_s21 = int_to_ptr.vmem [resolvable:$false] %s2137_s21 }
  0xfd   : > { %v1870_v32 = vsel %vm1065_vm3, 1.0, %v2234_v10  ;;  %p2140_p6 = scmp.lt.s32.totalorder %s2698_s28, %s2138_s21 }
 0x103   : > { %v909_v3 = vpop.xlane.xlu0 %908 }
 0x104   : > { %v911_v4 = vmul.f32 0.03125, %v909_v3 }
 0x106   : > { %v912_v5 = vsub.f32 %v2561_v1, %v911_v4 }
 0x108   : > { %v913_v6 = vmul.f32 %v912_v5, %v912_v5 }
 0x10a   : > { %v914_v7 = vsel %vm906_vm1, %v913_v6, 0.0 }
 0x10b   : > { %915 = vadd.xlane.f32.xlu0 %v914_v7 }
 0x198   : > { %v916_v15 = vpop.xlane.xlu0 %915 }
 0x199   : > { %v917_v16 = vmul.f32 0.03125, %v916_v15 }
 0x19b   : > { %v918_v17 = vadd.f32 1e-05, %v917_v16 }
 0x19d   : > { %2095 = vrsqrt.f32 %v918_v17 }
 0x1a7   : > { %v2096_v18 = vpop.eup %2095 }
 0x1a8   : > { %v920_v20 = vmul.f32 %v2096_v18, %v912_v5 }
 0x1aa   : > { %v927_v22 = vmul.f32 %v1861_v19, %v920_v20 }
 0x1ac   : > { %v934_v24 = vadd.f32 %v1862_v21, %v927_v22 }
 0x1ae   : > { %v935_v25 = vpack.c.bf16 %v934_v24, %v934_v24 }
 0x1b0   : > { %1930 = vmatmul.mubr.msk.bf16.vlgmr.msra.gmra.mrb[0].mxu0 %vm906_vm1, %v935_v25  ;;  %1938 = vmatmul.mubr.msk.bf16.vlgmr.msra.gmra.mrb[0].mxu1 %vm906_vm1, %v935_v25 }
 0x1b1   : > { %1942 = vmatpush3.msra.mxu0 %v1068_v26  ;;  %1943 = vmatprep.mubr.msk.f32.mxu0 %vm2235_vm2, %v2234_v10 }
 0x1b2   : > { %1990 = vmatprep.subr.bf16.mxu0 %v2237_v29  ;;  %1966 = vmatprep.mubr.msk.bf16.mxu1 %vm2235_vm2, %v2234_v10 }
 0x1b3   : > { %1963 = vmatpush3.bf16.msra.mxu1 %v2087_v13 }
 0x1b4   : > { %1964 = vmatprep.subr.bf16.mxu1 %v2234_v10 }
 0x1b7   : > { %1965 = vmatpush3.bf16.msra.mxu1 %v2088_v14 }
 0x1b8   : > { %1944 = vmatmul.mubr.msk.f32.vlgmr.msra.gmra.mrb[4].mxu0 %vm1069_vm4, %v1870_v32  ;;  %1978 = vmatprep.subr.bf16.mxu1 %v2234_v10 }
 0x1b9   : > { %1992 = vmatpush3.bf16.msra.mxu0 %v1991_v33  ;;  %1954 = vmatprep.mubr.msk.f32.mxu0 %vm2235_vm2, %v2234_v10 }
 0x1ba   : > { %1993 = vmatprep.subr.bf16.mxu0 %v2237_v29 }
 0x1bd   : > { %1995 = vmatpush3.bf16.msra.mxu0 %v1994_v36 }
 0x1be   : > { %1957 = vmatprep.subr.mxu0 %v2234_v10 }
 0x283   : > { %v996_v41 = vpop.f32.mrb[0].mxu0  ;;  %v1053_v42 = vpop.f32.mrb[0].mxu1 }
 0x284   : > { %v997_v43 = vadd.f32 %v1863_v38, %v996_v41  ;;  %v1054_v44 = vadd.f32 %v1053_v42, %v1006_v39  ;;  %v1931_v45 = vpop.f32.mrb[1].mxu0  ;;  %v1939_v46 = vpop.f32.mrb[1].mxu1 }
 0x285   : > { %v999_v47 = vpop.f32.mrb[2].mxu0  ;;  %v1056_v48 = vpop.f32.mrb[2].mxu1 }
 0x286   : > { %v1146_v49 = vrot.slane %v1054_v44, %v1145_v40  ;;  %v1940_v50 = vpop.f32.mrb[3].mxu1  ;;  %1319 = vrot.lane.b32.xlu1 %v997_v43, %s2238_s8  ;;  %v1932_v51 = vpop.f32.mrb[3].mxu0  ;;  %v1878_v48 = vld [vmem:[%s886_s12] ss:$0 sm:$0xff]  ;;  %s1891_s8 = sshll.u32 %s2862_s1, 7 }
 0x287   : > { %v1879_v50 = vld [vmem:[%s889_s4] ss:$0 sm:$0xff]  ;;  %s2696_s11 = scalar_lea.hbm %s2868_s10, %s1891_s8 }
 0x288   : > { %v1147_v52 = vmul.f32 %v1146_v49, %v997_v43  ;;  %v2089_v43 = vld [vmem:[%s2859_s22] sm:$0xff]   ;;  %s2139_s22 = scalar_lea.vmem %s2138_s21, 256 }
 0x289   : > { %p2141_p3 = scmp.lt.s32.totalorder %s2139_s22, %s2133_s14 }
 0x28a   : > { %1955 = vmatmul.mubr.msk.f32.vlgmr.msra.gmra.mrb[4].mxu0 %vm906_vm1, %v1147_v52 }
 0x28b   : > { %1959 = vmatprep.mubr.msk.f32.mxu0 %vm2235_vm2, %v2234_v10  ;;  %1958 = vmatpush3.msk.msra.mxu0 %vm1244_vm5, %v903_v53  ;;  %p2142_p8 = por %p2141_p3, %p2140_p6 }
 0x28c   : > { %1970 = vmatprep.subr.bf16.mxu0 %v2234_v10 }
 0x28d   : > { %p2143_p12 = pnand %p2142_p8, %p2136_p4 }
 0x2f8   : > { %v1320_v15 = vpop.permute.xlu1 %1319 }
 0x35d   : > { %v1217_v54 = vpop.f32.mrb[4].mxu0 }
 0x35e   : > { %v1222_v55 = vsel %vm1221_vm6, %v1217_v54, -inf  ;;  %v1956_v56 = vpop.f32.mrb[5].mxu0 }
 0x35f   : > { %v1223_v57 = vrot.slane %v1222_v55, 4  ;;  %v1880_v56 = vld [vmem:[%s2864_s25] ss:$0 sm:$0xff] }
 0x361   : > { %v1224_v58 = vmax.f32 %v1222_v55, %v1223_v57  ;;  %v2094_v55 = vld [vmem:[%s2536_s20 + $0x18] sm:$0xff]  }
 0x363   : > { %v1225_v59 = vrot.slane %v1224_v58, 2 }
 0x365   : > { %v1226_v60 = vmax.f32 %v1224_v58, %v1225_v59 }
 0x367   : > { %v1227_v61 = vrot.slane %v1226_v60, 1 }
 0x369   : > { %v1228_v62 = vmax.f32 %v1226_v60, %v1227_v61 }
 0x36b   : > { %v1229_v63 = vsub.f32 %v1217_v54, %v1228_v62  ;;  %v2093_v54 = vld [vmem:[%s2536_s20 + $0x10] sm:$0xff]  }
 0x36d   : > { %v1230_v0 = vmul.f32 1.442695, %v1229_v63 }
 0x36f   : > { %2097 = vpow2.f32 %v1230_v0 }
 0x379   : > { %v2098_v2 = vpop.eup %2097 }
 0x37a   : > { %v1232_v3 = vsel %vm1221_vm6, %v2098_v2, 0.0 }
 0x37b   : > { %v1233_v4 = vrot.slane %v1232_v3, 4 }
 0x37d   : > { %v1234_v5 = vadd.f32 %v1233_v4, %v1232_v3 }
 0x37f   : > { %v1235_v6 = vrot.slane %v1234_v5, 2 }
 0x381   : > { %v1236_v7 = vadd.f32 %v1235_v6, %v1234_v5 }
 0x383   : > { %v1237_v8 = vrot.slane %v1236_v7, 1 }
 0x385   : > { %v1238_v9 = vadd.f32 %v1237_v8, %v1236_v7 }
 0x387   : > { %2099 = vrcp.f32 %v1238_v9 }
 0x391   : > { %v2100_v11 = vpop.eup %2099 }
 0x392   : > { %v1240_v12 = vmul.f32 %v2100_v11, %v2098_v2 }
 0x394   : > { %1960 = vmatmul.mubr.msk.f32.vlgmr.msra.gmra.mrb[6].mxu0 %vm1221_vm6, %v1240_v12 }
 0x395   : > { %1974 = vmatprep.mubr.msk.bf16.mxu0 %vm2235_vm2, %v2234_v10  ;;  %1971 = vmatpush3.bf16.msra.mxu0 %v2089_v43 }
 0x396   : > { %1972 = vmatprep.subr.bf16.mxu0 %v2234_v10 }
 0x399   : > { %1973 = vmatpush3.bf16.msra.mxu0 %v2090_v37 }
 0x467   : > { %v1314_v16 = vpop.f32.mrb[6].mxu0 }
 0x468   : > { %v1322_v17 = vmul.f32 %v1320_v15, %v1314_v16  ;;  %v1961_v18 = vpop.f32.mrb[7].mxu0 }
 0x46a   : > { %v1323_v19 = vsel %vm906_vm1, %v1322_v17, 0.0 }
 0x46b   : > { %v1324_v20 = vrot.slane %v1323_v19, 4 }
 0x46d   : > { %v1325_v21 = vadd.f32 %v1324_v20, %v1323_v19 }
 0x46f   : > { %v1326_v22 = vrot.slane %v1325_v21, 2 }
 0x471   : > { %v1327_v23 = vadd.f32 %v1326_v22, %v1325_v21 }
 0x473   : > { %v1328_v24 = vrot.slane %v1327_v23, 1 }
 0x475   : > { %v1329_v25 = vadd.f32 %v1328_v24, %v1327_v23 }
 0x477   : > { %v1330_v26 = vpack.c.bf16 %v1329_v25, %v1329_v25 }
 0x479   : > { %1967 = vmatmul.mubr.msk.bf16.vlgmr.msra.gmra.mrb[4].mxu1 %vm906_vm1, %v1330_v26 }
 0x47a   : > { %1986 = vmatprep.mubr.msk.bf16.mxu1 %vm2235_vm2, %v2234_v10 }
 0x54c   : > { %v1385_v28 = vpop.f32.mrb[4].mxu1 }
 0x54d   : > { %v1386_v29 = vadd.f32 %v1385_v28, %v1335_v27  ;;  %v1968_v30 = vpop.f32.mrb[5].mxu1 }
 0x54e   : > { %v1388_v31 = vpop.f32.mrb[6].mxu1 }
 0x54f   : > { %v1394_v32 = vrot.slane %v1386_v29, %v1145_v40  ;;  %v1969_v33 = vpop.f32.mrb[7].mxu1  ;;  %v2092_v40 = vld [vmem:[%s2536_s20 + $0x8] sm:$0xff]  }
 0x551   : > { %v1395_v34 = vadd.f32 %v1394_v32, %v2561_v1  ;;  %v2091_v1 = vld [vmem:[%s2536_s20] sm:$0xff]   ;;  %s2865_s20 = sld [smem:[#allocation35_spill]] }
 0x552   : > { %1979 = vmatpush3.bf16.msra.mxu1 %v2091_v1 }
 0x553   : > { %v1398_v35 = vsel %vm906_vm1, %v1395_v34, 0.0  ;;  %1980 = vmatprep.subr.bf16.mxu1 %v2234_v10 }
 0x554   : > { %1399 = vadd.xlane.f32.xlu0 %v1398_v35 }
 0x556   : > { %1981 = vmatpush3.bf16.msra.mxu1 %v2092_v40 }
 0x557   : > { %1982 = vmatprep.subr.bf16.mxu1 %v2234_v10  ;;  %s2866_s18 = scalar_lea.vmem %s2865_s20, %s2478_s3  ;;  %s1580_s3 = scalar_lea.sflag [#allocation4], %s2464_s17 }
 0x55a   : > { %1983 = vmatpush3.bf16.msra.mxu1 %v2093_v54 }
 0x55b   : > { %1984 = vmatprep.subr.bf16.mxu1 %v2234_v10  ;;  %v1884_v10 = vld [vmem:[%s2866_s18] ss:$0 sm:$0xff] }
 0x55e   : > { %1985 = vmatpush3.bf16.msra.mxu1 %v2094_v55 }
 0x5e1   : > { %v1400_v36 = vpop.xlane.xlu0 %1399 }
 0x5e2   : > { %v1401_v38 = vmul.f32 0.03125, %v1400_v36 }
 0x5e4   : > { %v1402_v39 = vsub.f32 %v1395_v34, %v1401_v38 }
 0x5e6   : > { %v1403_v41 = vmul.f32 %v1402_v39, %v1402_v39 }
 0x5e8   : > { %v1404_v42 = vsel %vm906_vm1, %v1403_v41, 0.0 }
 0x5e9   : > { %1405 = vadd.xlane.f32.xlu1 %v1404_v42 }
 0x676   : > { %v1406_v44 = vpop.xlane.xlu1 %1405 }
 0x677   : > { %v1407_v45 = vmul.f32 0.03125, %v1406_v44 }
 0x679   : > { %v1408_v46 = vadd.f32 1e-05, %v1407_v45 }
 0x67b   : > { %2101 = vrsqrt.f32 %v1408_v46 }
 0x685   : > { %v2102_v47 = vpop.eup %2101 }
 0x686   : > { %v1410_v49 = vmul.f32 %v2102_v47, %v1402_v39 }
 0x688   : > { %v1417_v51 = vmul.f32 %v1878_v48, %v1410_v49 }
 0x68a   : > { %v1424_v52 = vadd.f32 %v1879_v50, %v1417_v51 }
 0x68c   : > { %v1425_v53 = vpack.c.bf16 %v1424_v52, %v1424_v52 }
 0x68e   : > { %1975 = vmatmul.mubr.msk.bf16.vlgmr.msra.gmra.mrb[8].mxu0 %vm906_vm1, %v1425_v53 }
 0x761   : > { %v1486_v57 = vpop.f32.mrb[8].mxu0 }
 0x762   : > { %v1487_v58 = vadd.f32 %v1880_v56, %v1486_v57  ;;  %v1976_v59 = vpop.f32.mrb[9].mxu0 }
 0x763   : > { %v1489_v60 = vpop.f32.mrb[10].mxu0 }
 0x764   : > { %v1492_v61 = vmax.f32 %v1487_v58, 0.0  ;;  %v1977_v62 = vpop.f32.mrb[11].mxu0 }
 0x766   : > { %v1493_v63 = vpack.c.bf16 %v1492_v61, %v1492_v61 }
 0x768   : > { %1987 = vmatmul.mubr.msk.bf16.vlgmr.msra.gmra.mrb[8].mxu1 %vm1533_vm7, %v1493_v63 }
 0x83b   : > { %v1571_v0 = vpop.f32.mrb[8].mxu1 }
 0x83c   : > { %v1572_v2 = vadd.f32 %v1884_v10, %v1571_v0  ;;  %v1988_v3 = vpop.f32.mrb[9].mxu1 }
 0x83d   : > { %v1574_v4 = vpop.f32.mrb[10].mxu1 }
 0x83e   : > { %v1577_v5 = vadd.f32 %v1572_v2, %v1395_v34  ;;  %v1989_v6 = vpop.f32.mrb[11].mxu1 }
 0x840   : > { %1578 = vst.msk [vmem:[%s2556_s2] sm:$0xff] %vm906_vm1, %v1577_v5 }
 0x841   : > { %2146 = shalt.err (!%p2143_p12)
}
 0x842   : > { %s2147_s17 = scalar_lea.hbm %s2696_s11, 128  ;;  %s2151_s30 = scalar_lea.hbm %s2868_s10, 256 }
 0x843   : > { %p2148_p1 = scmp.ne.s32.totalorder %s2696_s11, %s2147_s17  ;;  %p2152_p10 = scmp.lt.u32.totalorder %s2696_s11, %s2868_s10 }
 0x844   : > { %p2153_p11 = scmp.lt.u32.totalorder %s2151_s30, %s2147_s17  ;;  %p2155_p0 = scmp.lt.u32.totalorder %s2147_s17, %s2696_s11 }
 0x845   : > { %p2149_p2 = pnand %p2148_p1, %p2869_p7 }
 0x846   : > { %p2154_p9 = por %p2153_p11, %p2152_p10 }
 0x847   : > { %p2150_p5 = pneg %p2149_p2 }
 0x848   : > { %p2156_p13 = por %p2155_p0, %p2154_p9 }
 0x84a   : > { %p2157_p4 = pnand %p2156_p13, %p2150_p5 }
 0x84c   : > { %2160 = shalt.err (!%p2157_p4)
}
 0x84d   : > { %2000 = dma.vmem_to_hbm [thread:$0]  (%p2869_p7), %s2698_s28, 128, %s2696_s11, %s1580_s3  }
 0x84e PF: > { %s2870_s26 = sld [smem:[#allocation14_spill]]  ;;  %s2871_s23 = sld [smem:[#allocation8_spill]] }
 0x84f   : > { %s2872_s1 = sld [smem:[#allocation18_spill]] }
 0x854   : > { %p2011_p6 = scmp.ge.s32.totalorder %s2870_s26, 2  ;;  %s1605_s12 = sand.u32 1, %s2871_s23  }
 0x855   : > { %p2873_p3 = scmp.ne.s32.totalorder %s2872_s1, 0  ;;  %s1606_s27 = scalar_lea.sflag [#allocation4], %s1605_s12 }
 0x857   : > { %p2007_p8 = pnand %p2011_p6, %p2873_p3 }
 0x859   : > { %2198 = dma.done.wait (!%p2007_p8), %s1606_s27, 128  }
 0x85a   : > { %2200 = vsyncadd (!%p2007_p8), %s1606_s27, 4294967168  ;;  %s35_s23 = sadd.s32 1, %s2870_s26   ;;  %s2874_s0 = sld [smem:[#allocation9_spill]] }
 0x85b   : > { %p32_p12 = scmp.ge.s32.totalorder %s35_s23, 6   ;;  %s2875_s30 = sld [smem:[#allocation10_spill]] }
 0x85c   : > { %s2876_s20 = sld [smem:[#allocation19_spill]]  ;;  %s2877_s21 = sld [smem:[#allocation12_spill]] }
 0x85d   : > { %s2878_s1 = sld [smem:[#allocation13_spill]]  ;;  %s2879_s22 = sld [smem:[#allocation15_spill]] }
 0x85e   : > { %s2880_s2 = sld [smem:[#allocation16_spill]]  ;;  %34 = sbr.rel (!%p32_p12) target bundleno = 27 (0x1b), region = 193 }
 0x865   :  { %1611 = vsyncpa [#allocation3], 1 }
 0x866   :  { %1613 = vsyncpa [#allocation3 + $0x1], 1 }
 0x867   :  { %1614 = vsyncpa [#allocation4], 1 }
 0x868   :  { %1616 = vsyncpa [#allocation4 + $0x1], 1 }

</bundles_post_ra>
